<compile_context>
chip_gen: v7x
topology: tpu7x:2x2x1
jax: 0.10.0
libtpu: 0.0.40
codegen_flags: <defaults>
</compile_context>

<pallas_src>
import jax
import jax.numpy as jnp
import numpy as np
from jax.experimental import pallas as pl
from jax.experimental.pallas import tpu as pltpu

B, C, H, W = 2, 4, 16, 16          # small shapes consistent with the module
S = H * W                          # 256 lanes per image (multiple of 128)
R = B * C                          # 8 sublane rows: row index = b*C + c
K9 = 9 * R                         # 72 im2col rows (tile-aligned tap blocks)
NUM_RECURRENT = 2
EPS = 1e-5                         # nn.BatchNorm2d default eps
INV_N = 1.0 / (B * S)              # BN normalizes over batch*spatial per channel

assert B == 2, "cross-batch BN combine uses a single sublane roll (needs B == 2)"


# ----------------------------------- kernel --------------------------------- #
def rrb_kernel(x_ref, w_ref, m_ref, p_ref, o_ref):
    x = x_ref[...]                          # (R, S): rows = b*C+c, lanes = h*W+w
    w1 = w_ref[0]                           # (R, 9R) batch-block-diagonal weights
    w2 = w_ref[1]
    p = p_ref[...]                          # (R, 4) = [g1, bb1, g2, bb2], rows batch-replicated
    g1, bb1, g2, bb2 = p[:, 0:1], p[:, 1:2], p[:, 2:3], p[:, 3:4]

    def conv3x3(z, w_col):
        # 3x3 SAME conv: 8 lane rolls (XLU) + precomputed edge masks + one MXU dot.
        taps = []
        for t in range(9):
            kh, kw = t // 3, t % 3
            delta = (kh - 1) * W + (kw - 1)
            if delta == 0:
                taps.append(z)                                  # centre tap, always valid
            else:
                shifted = pltpu.roll(z, shift=(-delta) % S, axis=1)
                taps.append(shifted * m_ref[t])                 # mask streamed from VMEM
        patches = jnp.concatenate(taps, axis=0)                 # (9R, S), 8-aligned offsets
        # Conv bias intentionally omitted: cancelled exactly by the batch-stat
        # mean subtraction in batchnorm() below.
        return jnp.dot(w_col, patches, preferred_element_type=jnp.float32)

    def batchnorm(y, gamma, beta):
        # Training-mode BatchNorm2d (batch stats, biased variance), single pass.
        s1 = jnp.sum(y, axis=1, keepdims=True)                  # (R,1) per-(b,c) sums
        s2 = jnp.sum(y * y, axis=1, keepdims=True)
        t1 = s1 + pltpu.roll(s1, shift=C, axis=0)               # combine the two batch rows
        t2 = s2 + pltpu.roll(s2, shift=C, axis=0)               #   of each channel
        mean = t1 * INV_N
        var = t2 * INV_N - mean * mean                          # E[y^2] - mean^2
        scale = gamma * jax.lax.rsqrt(var + EPS)                # rsqrt on the EUP
        shift = beta - mean * scale
        return y * scale + shift                                # one fused scale/shift

    residual = x
    out = x
    for _ in range(NUM_RECURRENT):
        y = jnp.maximum(batchnorm(conv3x3(out, w1), g1, bb1), 0.0)   # ReLU
        y = batchnorm(conv3x3(y, w2), g2, bb2)
        out = jnp.maximum(y + residual, 0.0)                         # residual + ReLU
    o_ref[...] = out


# ------------------------- one-time parameter packing ------------------------ #
def _block_weight(w_hwio):
    # HWIO (3,3,Cin,Cout) -> (R, 9R): for tap t = kh*3+kw and batch b, the
    # (Cout, Cin) block sits at rows b*C.., cols t*R + b*C.. (block-diagonal
    # over batch so a single (R,9R) x (9R,S) dot does both images at once).
    w = np.asarray(w_hwio, np.float32)
    big = np.zeros((R, K9), np.float32)
    for t in range(9):
        kh, kw = divmod(t, 3)
        blk = w[kh, kw].T                                        # (Cout, Cin)
        for b in range(B):
            big[b * C:(b + 1) * C, t * R + b * C: t * R + (b + 1) * C] = blk
    return big


def _edge_masks():
    # (9, R, S) f32 validity masks per 3x3 tap (zero padding at image edges).
    h = np.arange(S) // W
    w = np.arange(S) % W
    m = np.zeros((9, R, S), np.float32)
    for t in range(9):
        kh, kw = divmod(t, 3)
        oh, ow = kh - 1, kw - 1
        valid = ((h + oh >= 0) & (h + oh < H) & (w + ow >= 0) & (w + ow < W))
        m[t] = np.broadcast_to(valid.astype(np.float32), (R, S))
    return m


def prepare_params(params):
    # Hoisted out of the per-call path (computed once at init).
    wpack = jnp.asarray(np.stack([_block_weight(params["w1"]),
                                  _block_weight(params["w2"])]))       # (2, R, 9R)
    masks = jnp.asarray(_edge_masks())                                 # (9, R, S)

    def rep(v):                      # per-channel vector -> per-(b,c) row value
        return np.tile(np.asarray(v, np.float32), B)

    bnpack = jnp.asarray(np.stack([rep(params["g1"]), rep(params["bb1"]),
                                   rep(params["g2"]), rep(params["bb2"])],
                                  axis=1))                             # (R, 4)
    # Conv biases b1/b2 are NOT packed: batch-stat BN cancels them exactly.
    return wpack, masks, bnpack


# ---------------------------------- wrapper ---------------------------------- #
@jax.jit
def recurrent_residual_block(x_nchw, wpack, masks, bnpack):
    # NCHW -> (B*C, H*W) is a pure, copy-free reshape (row = b*C+c, lane = h*W+w).
    x_slab = x_nchw.astype(jnp.float32).reshape(R, S)
    vspec = pl.BlockSpec(memory_space=pltpu.MemorySpace.VMEM)
    out_slab = pl.pallas_call(
        rrb_kernel,
        out_shape=jax.ShapeDtypeStruct((R, S), jnp.float32),
        in_specs=[vspec] * 4,
        out_specs=vspec,
    )(x_slab, wpack, masks, bnpack)
    return out_slab.reshape(B, C, H, W)


# ------------------------------ pure-JAX reference --------------------------- #
def ref_forward(x_nchw, params):
    # PyTorch semantics: conv biases included, two-pass biased-variance BN.
    x = jnp.transpose(x_nchw, (0, 2, 3, 1)).astype(jnp.float32)

    def conv(z, w, b):
        y = jax.lax.conv_general_dilated(
            z, w, (1, 1), "SAME", dimension_numbers=("NHWC", "HWIO", "NHWC"))
        return y + b.reshape(1, 1, 1, C)

    def bn(y, g, bb):
        m = jnp.mean(y, axis=(0, 1, 2), keepdims=True)
        v = jnp.mean((y - m) ** 2, axis=(0, 1, 2), keepdims=True)
        return (y - m) / jnp.sqrt(v + EPS) * g.reshape(1, 1, 1, C) + bb.reshape(1, 1, 1, C)

    residual = x
    out = x
    for _ in range(NUM_RECURRENT):
        y = jnp.maximum(bn(conv(out, params["w1"], params["b1"]),
                           params["g1"], params["bb1"]), 0.0)
        y = bn(conv(y, params["w2"], params["b2"]), params["g2"], params["bb2"])
        out = jnp.maximum(y + residual, 0.0)
    return jnp.transpose(out, (0, 3, 1, 2))


# ------------------------------------ main ----------------------------------- #
if __name__ == "__main__":
    key = jax.random.PRNGKey(0)
    ks = jax.random.split(key, 9)
    x = jax.random.normal(ks[0], (B, C, H, W), jnp.float32)
    params = {
        "w1": 0.2 * jax.random.normal(ks[1], (3, 3, C, C), jnp.float32),   # HWIO
        "b1": 0.1 * jax.random.normal(ks[2], (C,), jnp.float32),
        "g1": 1.0 + 0.1 * jax.random.normal(ks[3], (C,), jnp.float32),
        "bb1": 0.1 * jax.random.normal(ks[4], (C,), jnp.float32),
        "w2": 0.2 * jax.random.normal(ks[5], (3, 3, C, C), jnp.float32),   # HWIO
        "b2": 0.1 * jax.random.normal(ks[6], (C,), jnp.float32),
        "g2": 1.0 + 0.1 * jax.random.normal(ks[7], (C,), jnp.float32),
        "bb2": 0.1 * jax.random.normal(ks[8], (C,), jnp.float32),
    }

    wpack, masks, bnpack = prepare_params(params)   # once, outside the hot path

    out = recurrent_residual_block(x, wpack, masks, bnpack)
    out = jax.block_until_ready(out)
    assert out.shape == (B, C, H, W)

    ref = ref_forward(x, params)
    np.testing.assert_allclose(np.asarray(out), np.asarray(ref), rtol=2e-3, atol=2e-3)
    print("KERNEL_OK")
</pallas_src>

<mosaic_0001>
module attributes {stable_mosaic.version = 11 : i64} {
  func.func @rrb_kernel(%arg0: memref<8x256xf32, #tpu.memory_space<vmem>>, %arg1: memref<2x8x72xf32, #tpu.memory_space<vmem>>, %arg2: memref<9x8x256xf32, #tpu.memory_space<vmem>>, %arg3: memref<8x4xf32, #tpu.memory_space<vmem>>, %arg4: memref<8x256xf32, #tpu.memory_space<vmem>>) attributes {dimension_semantics = [], scalar_prefetch = 0 : i64, scratch_operands = 0 : i64, tpu.core_type = #tpu.core_type<tc>} {
    %c0 = arith.constant 0 : index
    %c0_0 = arith.constant 0 : index
    %0 = vector.load %arg0[%c0, %c0_0] : memref<8x256xf32, #tpu.memory_space<vmem>>, vector<8x256xf32>
    %c0_1 = arith.constant 0 : index
    %c0_2 = arith.constant 0 : index
    %c0_3 = arith.constant 0 : index
    %1 = vector.load %arg1[%c0_1, %c0_2, %c0_3] : memref<2x8x72xf32, #tpu.memory_space<vmem>>, vector<1x8x72xf32>
    %2 = vector.shape_cast %1 : vector<1x8x72xf32> to vector<8x72xf32>
    %c1 = arith.constant 1 : index
    %c0_4 = arith.constant 0 : index
    %c0_5 = arith.constant 0 : index
    %3 = vector.load %arg1[%c1, %c0_4, %c0_5] : memref<2x8x72xf32, #tpu.memory_space<vmem>>, vector<1x8x72xf32>
    %4 = vector.shape_cast %3 : vector<1x8x72xf32> to vector<8x72xf32>
    %c0_6 = arith.constant 0 : index
    %c0_7 = arith.constant 0 : index
    %5 = vector.load %arg3[%c0_6, %c0_7] : memref<8x4xf32, #tpu.memory_space<vmem>>, vector<8x4xf32>
    %6 = vector.extract_strided_slice %5 {offsets = [0, 0], sizes = [8, 1], strides = [1, 1]} : vector<8x4xf32> to vector<8x1xf32>
    %7 = vector.extract_strided_slice %5 {offsets = [0, 1], sizes = [8, 1], strides = [1, 1]} : vector<8x4xf32> to vector<8x1xf32>
    %8 = vector.extract_strided_slice %5 {offsets = [0, 2], sizes = [8, 1], strides = [1, 1]} : vector<8x4xf32> to vector<8x1xf32>
    %9 = vector.extract_strided_slice %5 {offsets = [0, 3], sizes = [8, 1], strides = [1, 1]} : vector<8x4xf32> to vector<8x1xf32>
    %c17_i32 = arith.constant 17 : i32
    %10 = tpu.dynamic_rotate %0 by %c17_i32 dim 1 : vector<8x256xf32>, i32 -> vector<8x256xf32>
    %c0_8 = arith.constant 0 : index
    %c0_9 = arith.constant 0 : index
    %c0_10 = arith.constant 0 : index
    %11 = vector.load %arg2[%c0_8, %c0_9, %c0_10] : memref<9x8x256xf32, #tpu.memory_space<vmem>>, vector<1x8x256xf32>
    %12 = vector.shape_cast %11 : vector<1x8x256xf32> to vector<8x256xf32>
    %13 = arith.mulf %10, %12 : vector<8x256xf32>
    %c16_i32 = arith.constant 16 : i32
    %14 = tpu.dynamic_rotate %0 by %c16_i32 dim 1 : vector<8x256xf32>, i32 -> vector<8x256xf32>
    %c1_11 = arith.constant 1 : index
    %c0_12 = arith.constant 0 : index
    %c0_13 = arith.constant 0 : index
    %15 = vector.load %arg2[%c1_11, %c0_12, %c0_13] : memref<9x8x256xf32, #tpu.memory_space<vmem>>, vector<1x8x256xf32>
    %16 = vector.shape_cast %15 : vector<1x8x256xf32> to vector<8x256xf32>
    %17 = arith.mulf %14, %16 : vector<8x256xf32>
    %c15_i32 = arith.constant 15 : i32
    %18 = tpu.dynamic_rotate %0 by %c15_i32 dim 1 : vector<8x256xf32>, i32 -> vector<8x256xf32>
    %c2 = arith.constant 2 : index
    %c0_14 = arith.constant 0 : index
    %c0_15 = arith.constant 0 : index
    %19 = vector.load %arg2[%c2, %c0_14, %c0_15] : memref<9x8x256xf32, #tpu.memory_space<vmem>>, vector<1x8x256xf32>
    %20 = vector.shape_cast %19 : vector<1x8x256xf32> to vector<8x256xf32>
    %21 = arith.mulf %18, %20 : vector<8x256xf32>
    %c1_i32 = arith.constant 1 : i32
    %22 = tpu.dynamic_rotate %0 by %c1_i32 dim 1 : vector<8x256xf32>, i32 -> vector<8x256xf32>
    %c3 = arith.constant 3 : index
    %c0_16 = arith.constant 0 : index
    %c0_17 = arith.constant 0 : index
    %23 = vector.load %arg2[%c3, %c0_16, %c0_17] : memref<9x8x256xf32, #tpu.memory_space<vmem>>, vector<1x8x256xf32>
    %24 = vector.shape_cast %23 : vector<1x8x256xf32> to vector<8x256xf32>
    %25 = arith.mulf %22, %24 : vector<8x256xf32>
    %c255_i32 = arith.constant 255 : i32
    %26 = tpu.dynamic_rotate %0 by %c255_i32 dim 1 : vector<8x256xf32>, i32 -> vector<8x256xf32>
    %c5 = arith.constant 5 : index
    %c0_18 = arith.constant 0 : index
    %c0_19 = arith.constant 0 : index
    %27 = vector.load %arg2[%c5, %c0_18, %c0_19] : memref<9x8x256xf32, #tpu.memory_space<vmem>>, vector<1x8x256xf32>
    %28 = vector.shape_cast %27 : vector<1x8x256xf32> to vector<8x256xf32>
    %29 = arith.mulf %26, %28 : vector<8x256xf32>
    %c241_i32 = arith.constant 241 : i32
    %30 = tpu.dynamic_rotate %0 by %c241_i32 dim 1 : vector<8x256xf32>, i32 -> vector<8x256xf32>
    %c6 = arith.constant 6 : index
    %c0_20 = arith.constant 0 : index
    %c0_21 = arith.constant 0 : index
    %31 = vector.load %arg2[%c6, %c0_20, %c0_21] : memref<9x8x256xf32, #tpu.memory_space<vmem>>, vector<1x8x256xf32>
    %32 = vector.shape_cast %31 : vector<1x8x256xf32> to vector<8x256xf32>
    %33 = arith.mulf %30, %32 : vector<8x256xf32>
    %c240_i32 = arith.constant 240 : i32
    %34 = tpu.dynamic_rotate %0 by %c240_i32 dim 1 : vector<8x256xf32>, i32 -> vector<8x256xf32>
    %c7 = arith.constant 7 : index
    %c0_22 = arith.constant 0 : index
    %c0_23 = arith.constant 0 : index
    %35 = vector.load %arg2[%c7, %c0_22, %c0_23] : memref<9x8x256xf32, #tpu.memory_space<vmem>>, vector<1x8x256xf32>
    %36 = vector.shape_cast %35 : vector<1x8x256xf32> to vector<8x256xf32>
    %37 = arith.mulf %34, %36 : vector<8x256xf32>
    %c239_i32 = arith.constant 239 : i32
    %38 = tpu.dynamic_rotate %0 by %c239_i32 dim 1 : vector<8x256xf32>, i32 -> vector<8x256xf32>
    %c8 = arith.constant 8 : index
    %c0_24 = arith.constant 0 : index
    %c0_25 = arith.constant 0 : index
    %39 = vector.load %arg2[%c8, %c0_24, %c0_25] : memref<9x8x256xf32, #tpu.memory_space<vmem>>, vector<1x8x256xf32>
    %40 = vector.shape_cast %39 : vector<1x8x256xf32> to vector<8x256xf32>
    %41 = arith.mulf %38, %40 : vector<8x256xf32>
    %42 = tpu.concatenate %13, %17, %21, %25, %0, %29, %33, %37, %41 in 0 : vector<8x256xf32>, vector<8x256xf32>, vector<8x256xf32>, vector<8x256xf32>, vector<8x256xf32>, vector<8x256xf32>, vector<8x256xf32>, vector<8x256xf32>, vector<8x256xf32> -> vector<72x256xf32>
    %cst = arith.constant dense<0.000000e+00> : vector<8x256xf32>
    %43 = tpu.matmul %2, %42, %cst {dimension_numbers = #tpu.dot_dimension_numbers<[1], [0], [0], [1], [0, 0, 1, 1], [], []>} : vector<8x72xf32>, vector<72x256xf32>, vector<8x256xf32> -> vector<8x256xf32>
    %cst_26 = arith.constant dense<0.000000e+00> : vector<8xf32>
    %44 = vector.multi_reduction <add>, %43, %cst_26 [1] : vector<8x256xf32> to vector<8xf32>
    %45 = vector.shape_cast %44 : vector<8xf32> to vector<8x1xf32>
    %46 = arith.mulf %43, %43 : vector<8x256xf32>
    %cst_27 = arith.constant dense<0.000000e+00> : vector<8xf32>
    %47 = vector.multi_reduction <add>, %46, %cst_27 [1] : vector<8x256xf32> to vector<8xf32>
    %48 = vector.shape_cast %47 : vector<8xf32> to vector<8x1xf32>
    %c4_i32 = arith.constant 4 : i32
    %49 = tpu.dynamic_rotate %45 by %c4_i32 dim 0 : vector<8x1xf32>, i32 -> vector<8x1xf32>
    %50 = arith.addf %45, %49 : vector<8x1xf32>
    %c4_i32_28 = arith.constant 4 : i32
    %51 = tpu.dynamic_rotate %48 by %c4_i32_28 dim 0 : vector<8x1xf32>, i32 -> vector<8x1xf32>
    %52 = arith.addf %48, %51 : vector<8x1xf32>
    %cst_29 = arith.constant 0.001953125 : f32
    %53 = vector.broadcast %cst_29 : f32 to vector<8x1xf32>
    %54 = arith.mulf %50, %53 : vector<8x1xf32>
    %cst_30 = arith.constant 0.001953125 : f32
    %55 = vector.broadcast %cst_30 : f32 to vector<8x1xf32>
    %56 = arith.mulf %52, %55 : vector<8x1xf32>
    %57 = arith.mulf %54, %54 : vector<8x1xf32>
    %58 = arith.subf %56, %57 : vector<8x1xf32>
    %cst_31 = arith.constant 9.99999974E-6 : f32
    %59 = vector.broadcast %cst_31 : f32 to vector<8x1xf32>
    %60 = arith.addf %58, %59 : vector<8x1xf32>
    %61 = math.rsqrt %60 : vector<8x1xf32>
    %62 = arith.mulf %6, %61 : vector<8x1xf32>
    %63 = arith.mulf %54, %62 : vector<8x1xf32>
    %64 = arith.subf %7, %63 : vector<8x1xf32>
    %65 = vector.broadcast %62 : vector<8x1xf32> to vector<8x256xf32>
    %66 = arith.mulf %43, %65 : vector<8x256xf32>
    %67 = vector.broadcast %64 : vector<8x1xf32> to vector<8x256xf32>
    %68 = arith.addf %66, %67 : vector<8x256xf32>
    %cst_32 = arith.constant 0.000000e+00 : f32
    %69 = vector.broadcast %cst_32 : f32 to vector<8x256xf32>
    %70 = arith.maximumf %68, %69 : vector<8x256xf32>
    %c17_i32_33 = arith.constant 17 : i32
    %71 = tpu.dynamic_rotate %70 by %c17_i32_33 dim 1 : vector<8x256xf32>, i32 -> vector<8x256xf32>
    %c0_34 = arith.constant 0 : index
    %c0_35 = arith.constant 0 : index
    %c0_36 = arith.constant 0 : index
    %72 = vector.load %arg2[%c0_34, %c0_35, %c0_36] : memref<9x8x256xf32, #tpu.memory_space<vmem>>, vector<1x8x256xf32>
    %73 = vector.shape_cast %72 : vector<1x8x256xf32> to vector<8x256xf32>
    %74 = arith.mulf %71, %73 : vector<8x256xf32>
    %c16_i32_37 = arith.constant 16 : i32
    %75 = tpu.dynamic_rotate %70 by %c16_i32_37 dim 1 : vector<8x256xf32>, i32 -> vector<8x256xf32>
    %c1_38 = arith.constant 1 : index
    %c0_39 = arith.constant 0 : index
    %c0_40 = arith.constant 0 : index
    %76 = vector.load %arg2[%c1_38, %c0_39, %c0_40] : memref<9x8x256xf32, #tpu.memory_space<vmem>>, vector<1x8x256xf32>
    %77 = vector.shape_cast %76 : vector<1x8x256xf32> to vector<8x256xf32>
    %78 = arith.mulf %75, %77 : vector<8x256xf32>
    %c15_i32_41 = arith.constant 15 : i32
    %79 = tpu.dynamic_rotate %70 by %c15_i32_41 dim 1 : vector<8x256xf32>, i32 -> vector<8x256xf32>
    %c2_42 = arith.constant 2 : index
    %c0_43 = arith.constant 0 : index
    %c0_44 = arith.constant 0 : index
    %80 = vector.load %arg2[%c2_42, %c0_43, %c0_44] : memref<9x8x256xf32, #tpu.memory_space<vmem>>, vector<1x8x256xf32>
    %81 = vector.shape_cast %80 : vector<1x8x256xf32> to vector<8x256xf32>
    %82 = arith.mulf %79, %81 : vector<8x256xf32>
    %c1_i32_45 = arith.constant 1 : i32
    %83 = tpu.dynamic_rotate %70 by %c1_i32_45 dim 1 : vector<8x256xf32>, i32 -> vector<8x256xf32>
    %c3_46 = arith.constant 3 : index
    %c0_47 = arith.constant 0 : index
    %c0_48 = arith.constant 0 : index
    %84 = vector.load %arg2[%c3_46, %c0_47, %c0_48] : memref<9x8x256xf32, #tpu.memory_space<vmem>>, vector<1x8x256xf32>
    %85 = vector.shape_cast %84 : vector<1x8x256xf32> to vector<8x256xf32>
    %86 = arith.mulf %83, %85 : vector<8x256xf32>
    %c255_i32_49 = arith.constant 255 : i32
    %87 = tpu.dynamic_rotate %70 by %c255_i32_49 dim 1 : vector<8x256xf32>, i32 -> vector<8x256xf32>
    %c5_50 = arith.constant 5 : index
    %c0_51 = arith.constant 0 : index
    %c0_52 = arith.constant 0 : index
    %88 = vector.load %arg2[%c5_50, %c0_51, %c0_52] : memref<9x8x256xf32, #tpu.memory_space<vmem>>, vector<1x8x256xf32>
    %89 = vector.shape_cast %88 : vector<1x8x256xf32> to vector<8x256xf32>
    %90 = arith.mulf %87, %89 : vector<8x256xf32>
    %c241_i32_53 = arith.constant 241 : i32
    %91 = tpu.dynamic_rotate %70 by %c241_i32_53 dim 1 : vector<8x256xf32>, i32 -> vector<8x256xf32>
    %c6_54 = arith.constant 6 : index
    %c0_55 = arith.constant 0 : index
    %c0_56 = arith.constant 0 : index
    %92 = vector.load %arg2[%c6_54, %c0_55, %c0_56] : memref<9x8x256xf32, #tpu.memory_space<vmem>>, vector<1x8x256xf32>
    %93 = vector.shape_cast %92 : vector<1x8x256xf32> to vector<8x256xf32>
    %94 = arith.mulf %91, %93 : vector<8x256xf32>
    %c240_i32_57 = arith.constant 240 : i32
    %95 = tpu.dynamic_rotate %70 by %c240_i32_57 dim 1 : vector<8x256xf32>, i32 -> vector<8x256xf32>
    %c7_58 = arith.constant 7 : index
    %c0_59 = arith.constant 0 : index
    %c0_60 = arith.constant 0 : index
    %96 = vector.load %arg2[%c7_58, %c0_59, %c0_60] : memref<9x8x256xf32, #tpu.memory_space<vmem>>, vector<1x8x256xf32>
    %97 = vector.shape_cast %96 : vector<1x8x256xf32> to vector<8x256xf32>
    %98 = arith.mulf %95, %97 : vector<8x256xf32>
    %c239_i32_61 = arith.constant 239 : i32
    %99 = tpu.dynamic_rotate %70 by %c239_i32_61 dim 1 : vector<8x256xf32>, i32 -> vector<8x256xf32>
    %c8_62 = arith.constant 8 : index
    %c0_63 = arith.constant 0 : index
    %c0_64 = arith.constant 0 : index
    %100 = vector.load %arg2[%c8_62, %c0_63, %c0_64] : memref<9x8x256xf32, #tpu.memory_space<vmem>>, vector<1x8x256xf32>
    %101 = vector.shape_cast %100 : vector<1x8x256xf32> to vector<8x256xf32>
    %102 = arith.mulf %99, %101 : vector<8x256xf32>
    %103 = tpu.concatenate %74, %78, %82, %86, %70, %90, %94, %98, %102 in 0 : vector<8x256xf32>, vector<8x256xf32>, vector<8x256xf32>, vector<8x256xf32>, vector<8x256xf32>, vector<8x256xf32>, vector<8x256xf32>, vector<8x256xf32>, vector<8x256xf32> -> vector<72x256xf32>
    %cst_65 = arith.constant dense<0.000000e+00> : vector<8x256xf32>
    %104 = tpu.matmul %4, %103, %cst_65 {dimension_numbers = #tpu.dot_dimension_numbers<[1], [0], [0], [1], [0, 0, 1, 1], [], []>} : vector<8x72xf32>, vector<72x256xf32>, vector<8x256xf32> -> vector<8x256xf32>
    %cst_66 = arith.constant dense<0.000000e+00> : vector<8xf32>
    %105 = vector.multi_reduction <add>, %104, %cst_66 [1] : vector<8x256xf32> to vector<8xf32>
    %106 = vector.shape_cast %105 : vector<8xf32> to vector<8x1xf32>
    %107 = arith.mulf %104, %104 : vector<8x256xf32>
    %cst_67 = arith.constant dense<0.000000e+00> : vector<8xf32>
    %108 = vector.multi_reduction <add>, %107, %cst_67 [1] : vector<8x256xf32> to vector<8xf32>
    %109 = vector.shape_cast %108 : vector<8xf32> to vector<8x1xf32>
    %c4_i32_68 = arith.constant 4 : i32
    %110 = tpu.dynamic_rotate %106 by %c4_i32_68 dim 0 : vector<8x1xf32>, i32 -> vector<8x1xf32>
    %111 = arith.addf %106, %110 : vector<8x1xf32>
    %c4_i32_69 = arith.constant 4 : i32
    %112 = tpu.dynamic_rotate %109 by %c4_i32_69 dim 0 : vector<8x1xf32>, i32 -> vector<8x1xf32>
    %113 = arith.addf %109, %112 : vector<8x1xf32>
    %cst_70 = arith.constant 0.001953125 : f32
    %114 = vector.broadcast %cst_70 : f32 to vector<8x1xf32>
    %115 = arith.mulf %111, %114 : vector<8x1xf32>
    %cst_71 = arith.constant 0.001953125 : f32
    %116 = vector.broadcast %cst_71 : f32 to vector<8x1xf32>
    %117 = arith.mulf %113, %116 : vector<8x1xf32>
    %118 = arith.mulf %115, %115 : vector<8x1xf32>
    %119 = arith.subf %117, %118 : vector<8x1xf32>
    %cst_72 = arith.constant 9.99999974E-6 : f32
    %120 = vector.broadcast %cst_72 : f32 to vector<8x1xf32>
    %121 = arith.addf %119, %120 : vector<8x1xf32>
    %122 = math.rsqrt %121 : vector<8x1xf32>
    %123 = arith.mulf %8, %122 : vector<8x1xf32>
    %124 = arith.mulf %115, %123 : vector<8x1xf32>
    %125 = arith.subf %9, %124 : vector<8x1xf32>
    %126 = vector.broadcast %123 : vector<8x1xf32> to vector<8x256xf32>
    %127 = arith.mulf %104, %126 : vector<8x256xf32>
    %128 = vector.broadcast %125 : vector<8x1xf32> to vector<8x256xf32>
    %129 = arith.addf %127, %128 : vector<8x256xf32>
    %130 = arith.addf %129, %0 : vector<8x256xf32>
    %cst_73 = arith.constant 0.000000e+00 : f32
    %131 = vector.broadcast %cst_73 : f32 to vector<8x256xf32>
    %132 = arith.maximumf %130, %131 : vector<8x256xf32>
    %c17_i32_74 = arith.constant 17 : i32
    %133 = tpu.dynamic_rotate %132 by %c17_i32_74 dim 1 : vector<8x256xf32>, i32 -> vector<8x256xf32>
    %c0_75 = arith.constant 0 : index
    %c0_76 = arith.constant 0 : index
    %c0_77 = arith.constant 0 : index
    %134 = vector.load %arg2[%c0_75, %c0_76, %c0_77] : memref<9x8x256xf32, #tpu.memory_space<vmem>>, vector<1x8x256xf32>
    %135 = vector.shape_cast %134 : vector<1x8x256xf32> to vector<8x256xf32>
    %136 = arith.mulf %133, %135 : vector<8x256xf32>
    %c16_i32_78 = arith.constant 16 : i32
    %137 = tpu.dynamic_rotate %132 by %c16_i32_78 dim 1 : vector<8x256xf32>, i32 -> vector<8x256xf32>
    %c1_79 = arith.constant 1 : index
    %c0_80 = arith.constant 0 : index
    %c0_81 = arith.constant 0 : index
    %138 = vector.load %arg2[%c1_79, %c0_80, %c0_81] : memref<9x8x256xf32, #tpu.memory_space<vmem>>, vector<1x8x256xf32>
    %139 = vector.shape_cast %138 : vector<1x8x256xf32> to vector<8x256xf32>
    %140 = arith.mulf %137, %139 : vector<8x256xf32>
    %c15_i32_82 = arith.constant 15 : i32
    %141 = tpu.dynamic_rotate %132 by %c15_i32_82 dim 1 : vector<8x256xf32>, i32 -> vector<8x256xf32>
    %c2_83 = arith.constant 2 : index
    %c0_84 = arith.constant 0 : index
    %c0_85 = arith.constant 0 : index
    %142 = vector.load %arg2[%c2_83, %c0_84, %c0_85] : memref<9x8x256xf32, #tpu.memory_space<vmem>>, vector<1x8x256xf32>
    %143 = vector.shape_cast %142 : vector<1x8x256xf32> to vector<8x256xf32>
    %144 = arith.mulf %141, %143 : vector<8x256xf32>
    %c1_i32_86 = arith.constant 1 : i32
    %145 = tpu.dynamic_rotate %132 by %c1_i32_86 dim 1 : vector<8x256xf32>, i32 -> vector<8x256xf32>
    %c3_87 = arith.constant 3 : index
    %c0_88 = arith.constant 0 : index
    %c0_89 = arith.constant 0 : index
    %146 = vector.load %arg2[%c3_87, %c0_88, %c0_89] : memref<9x8x256xf32, #tpu.memory_space<vmem>>, vector<1x8x256xf32>
    %147 = vector.shape_cast %146 : vector<1x8x256xf32> to vector<8x256xf32>
    %148 = arith.mulf %145, %147 : vector<8x256xf32>
    %c255_i32_90 = arith.constant 255 : i32
    %149 = tpu.dynamic_rotate %132 by %c255_i32_90 dim 1 : vector<8x256xf32>, i32 -> vector<8x256xf32>
    %c5_91 = arith.constant 5 : index
    %c0_92 = arith.constant 0 : index
    %c0_93 = arith.constant 0 : index
    %150 = vector.load %arg2[%c5_91, %c0_92, %c0_93] : memref<9x8x256xf32, #tpu.memory_space<vmem>>, vector<1x8x256xf32>
    %151 = vector.shape_cast %150 : vector<1x8x256xf32> to vector<8x256xf32>
    %152 = arith.mulf %149, %151 : vector<8x256xf32>
    %c241_i32_94 = arith.constant 241 : i32
    %153 = tpu.dynamic_rotate %132 by %c241_i32_94 dim 1 : vector<8x256xf32>, i32 -> vector<8x256xf32>
    %c6_95 = arith.constant 6 : index
    %c0_96 = arith.constant 0 : index
    %c0_97 = arith.constant 0 : index
    %154 = vector.load %arg2[%c6_95, %c0_96, %c0_97] : memref<9x8x256xf32, #tpu.memory_space<vmem>>, vector<1x8x256xf32>
    %155 = vector.shape_cast %154 : vector<1x8x256xf32> to vector<8x256xf32>
    %156 = arith.mulf %153, %155 : vector<8x256xf32>
    %c240_i32_98 = arith.constant 240 : i32
    %157 = tpu.dynamic_rotate %132 by %c240_i32_98 dim 1 : vector<8x256xf32>, i32 -> vector<8x256xf32>
    %c7_99 = arith.constant 7 : index
    %c0_100 = arith.constant 0 : index
    %c0_101 = arith.constant 0 : index
    %158 = vector.load %arg2[%c7_99, %c0_100, %c0_101] : memref<9x8x256xf32, #tpu.memory_space<vmem>>, vector<1x8x256xf32>
    %159 = vector.shape_cast %158 : vector<1x8x256xf32> to vector<8x256xf32>
    %160 = arith.mulf %157, %159 : vector<8x256xf32>
    %c239_i32_102 = arith.constant 239 : i32
    %161 = tpu.dynamic_rotate %132 by %c239_i32_102 dim 1 : vector<8x256xf32>, i32 -> vector<8x256xf32>
    %c8_103 = arith.constant 8 : index
    %c0_104 = arith.constant 0 : index
    %c0_105 = arith.constant 0 : index
    %162 = vector.load %arg2[%c8_103, %c0_104, %c0_105] : memref<9x8x256xf32, #tpu.memory_space<vmem>>, vector<1x8x256xf32>
    %163 = vector.shape_cast %162 : vector<1x8x256xf32> to vector<8x256xf32>
    %164 = arith.mulf %161, %163 : vector<8x256xf32>
    %165 = tpu.concatenate %136, %140, %144, %148, %132, %152, %156, %160, %164 in 0 : vector<8x256xf32>, vector<8x256xf32>, vector<8x256xf32>, vector<8x256xf32>, vector<8x256xf32>, vector<8x256xf32>, vector<8x256xf32>, vector<8x256xf32>, vector<8x256xf32> -> vector<72x256xf32>
    %cst_106 = arith.constant dense<0.000000e+00> : vector<8x256xf32>
    %166 = tpu.matmul %2, %165, %cst_106 {dimension_numbers = #tpu.dot_dimension_numbers<[1], [0], [0], [1], [0, 0, 1, 1], [], []>} : vector<8x72xf32>, vector<72x256xf32>, vector<8x256xf32> -> vector<8x256xf32>
    %cst_107 = arith.constant dense<0.000000e+00> : vector<8xf32>
    %167 = vector.multi_reduction <add>, %166, %cst_107 [1] : vector<8x256xf32> to vector<8xf32>
    %168 = vector.shape_cast %167 : vector<8xf32> to vector<8x1xf32>
    %169 = arith.mulf %166, %166 : vector<8x256xf32>
    %cst_108 = arith.constant dense<0.000000e+00> : vector<8xf32>
    %170 = vector.multi_reduction <add>, %169, %cst_108 [1] : vector<8x256xf32> to vector<8xf32>
    %171 = vector.shape_cast %170 : vector<8xf32> to vector<8x1xf32>
    %c4_i32_109 = arith.constant 4 : i32
    %172 = tpu.dynamic_rotate %168 by %c4_i32_109 dim 0 : vector<8x1xf32>, i32 -> vector<8x1xf32>
    %173 = arith.addf %168, %172 : vector<8x1xf32>
    %c4_i32_110 = arith.constant 4 : i32
    %174 = tpu.dynamic_rotate %171 by %c4_i32_110 dim 0 : vector<8x1xf32>, i32 -> vector<8x1xf32>
    %175 = arith.addf %171, %174 : vector<8x1xf32>
    %cst_111 = arith.constant 0.001953125 : f32
    %176 = vector.broadcast %cst_111 : f32 to vector<8x1xf32>
    %177 = arith.mulf %173, %176 : vector<8x1xf32>
    %cst_112 = arith.constant 0.001953125 : f32
    %178 = vector.broadcast %cst_112 : f32 to vector<8x1xf32>
    %179 = arith.mulf %175, %178 : vector<8x1xf32>
    %180 = arith.mulf %177, %177 : vector<8x1xf32>
    %181 = arith.subf %179, %180 : vector<8x1xf32>
    %cst_113 = arith.constant 9.99999974E-6 : f32
    %182 = vector.broadcast %cst_113 : f32 to vector<8x1xf32>
    %183 = arith.addf %181, %182 : vector<8x1xf32>
    %184 = math.rsqrt %183 : vector<8x1xf32>
    %185 = arith.mulf %6, %184 : vector<8x1xf32>
    %186 = arith.mulf %177, %185 : vector<8x1xf32>
    %187 = arith.subf %7, %186 : vector<8x1xf32>
    %188 = vector.broadcast %185 : vector<8x1xf32> to vector<8x256xf32>
    %189 = arith.mulf %166, %188 : vector<8x256xf32>
    %190 = vector.broadcast %187 : vector<8x1xf32> to vector<8x256xf32>
    %191 = arith.addf %189, %190 : vector<8x256xf32>
    %cst_114 = arith.constant 0.000000e+00 : f32
    %192 = vector.broadcast %cst_114 : f32 to vector<8x256xf32>
    %193 = arith.maximumf %191, %192 : vector<8x256xf32>
    %c17_i32_115 = arith.constant 17 : i32
    %194 = tpu.dynamic_rotate %193 by %c17_i32_115 dim 1 : vector<8x256xf32>, i32 -> vector<8x256xf32>
    %c0_116 = arith.constant 0 : index
    %c0_117 = arith.constant 0 : index
    %c0_118 = arith.constant 0 : index
    %195 = vector.load %arg2[%c0_116, %c0_117, %c0_118] : memref<9x8x256xf32, #tpu.memory_space<vmem>>, vector<1x8x256xf32>
    %196 = vector.shape_cast %195 : vector<1x8x256xf32> to vector<8x256xf32>
    %197 = arith.mulf %194, %196 : vector<8x256xf32>
    %c16_i32_119 = arith.constant 16 : i32
    %198 = tpu.dynamic_rotate %193 by %c16_i32_119 dim 1 : vector<8x256xf32>, i32 -> vector<8x256xf32>
    %c1_120 = arith.constant 1 : index
    %c0_121 = arith.constant 0 : index
    %c0_122 = arith.constant 0 : index
    %199 = vector.load %arg2[%c1_120, %c0_121, %c0_122] : memref<9x8x256xf32, #tpu.memory_space<vmem>>, vector<1x8x256xf32>
    %200 = vector.shape_cast %199 : vector<1x8x256xf32> to vector<8x256xf32>
    %201 = arith.mulf %198, %200 : vector<8x256xf32>
    %c15_i32_123 = arith.constant 15 : i32
    %202 = tpu.dynamic_rotate %193 by %c15_i32_123 dim 1 : vector<8x256xf32>, i32 -> vector<8x256xf32>
    %c2_124 = arith.constant 2 : index
    %c0_125 = arith.constant 0 : index
    %c0_126 = arith.constant 0 : index
    %203 = vector.load %arg2[%c2_124, %c0_125, %c0_126] : memref<9x8x256xf32, #tpu.memory_space<vmem>>, vector<1x8x256xf32>
    %204 = vector.shape_cast %203 : vector<1x8x256xf32> to vector<8x256xf32>
    %205 = arith.mulf %202, %204 : vector<8x256xf32>
    %c1_i32_127 = arith.constant 1 : i32
    %206 = tpu.dynamic_rotate %193 by %c1_i32_127 dim 1 : vector<8x256xf32>, i32 -> vector<8x256xf32>
    %c3_128 = arith.constant 3 : index
    %c0_129 = arith.constant 0 : index
    %c0_130 = arith.constant 0 : index
    %207 = vector.load %arg2[%c3_128, %c0_129, %c0_130] : memref<9x8x256xf32, #tpu.memory_space<vmem>>, vector<1x8x256xf32>
    %208 = vector.shape_cast %207 : vector<1x8x256xf32> to vector<8x256xf32>
    %209 = arith.mulf %206, %208 : vector<8x256xf32>
    %c255_i32_131 = arith.constant 255 : i32
    %210 = tpu.dynamic_rotate %193 by %c255_i32_131 dim 1 : vector<8x256xf32>, i32 -> vector<8x256xf32>
    %c5_132 = arith.constant 5 : index
    %c0_133 = arith.constant 0 : index
    %c0_134 = arith.constant 0 : index
    %211 = vector.load %arg2[%c5_132, %c0_133, %c0_134] : memref<9x8x256xf32, #tpu.memory_space<vmem>>, vector<1x8x256xf32>
    %212 = vector.shape_cast %211 : vector<1x8x256xf32> to vector<8x256xf32>
    %213 = arith.mulf %210, %212 : vector<8x256xf32>
    %c241_i32_135 = arith.constant 241 : i32
    %214 = tpu.dynamic_rotate %193 by %c241_i32_135 dim 1 : vector<8x256xf32>, i32 -> vector<8x256xf32>
    %c6_136 = arith.constant 6 : index
    %c0_137 = arith.constant 0 : index
    %c0_138 = arith.constant 0 : index
    %215 = vector.load %arg2[%c6_136, %c0_137, %c0_138] : memref<9x8x256xf32, #tpu.memory_space<vmem>>, vector<1x8x256xf32>
    %216 = vector.shape_cast %215 : vector<1x8x256xf32> to vector<8x256xf32>
    %217 = arith.mulf %214, %216 : vector<8x256xf32>
    %c240_i32_139 = arith.constant 240 : i32
    %218 = tpu.dynamic_rotate %193 by %c240_i32_139 dim 1 : vector<8x256xf32>, i32 -> vector<8x256xf32>
    %c7_140 = arith.constant 7 : index
    %c0_141 = arith.constant 0 : index
    %c0_142 = arith.constant 0 : index
    %219 = vector.load %arg2[%c7_140, %c0_141, %c0_142] : memref<9x8x256xf32, #tpu.memory_space<vmem>>, vector<1x8x256xf32>
    %220 = vector.shape_cast %219 : vector<1x8x256xf32> to vector<8x256xf32>
    %221 = arith.mulf %218, %220 : vector<8x256xf32>
    %c239_i32_143 = arith.constant 239 : i32
    %222 = tpu.dynamic_rotate %193 by %c239_i32_143 dim 1 : vector<8x256xf32>, i32 -> vector<8x256xf32>
    %c8_144 = arith.constant 8 : index
    %c0_145 = arith.constant 0 : index
    %c0_146 = arith.constant 0 : index
    %223 = vector.load %arg2[%c8_144, %c0_145, %c0_146] : memref<9x8x256xf32, #tpu.memory_space<vmem>>, vector<1x8x256xf32>
    %224 = vector.shape_cast %223 : vector<1x8x256xf32> to vector<8x256xf32>
    %225 = arith.mulf %222, %224 : vector<8x256xf32>
    %226 = tpu.concatenate %197, %201, %205, %209, %193, %213, %217, %221, %225 in 0 : vector<8x256xf32>, vector<8x256xf32>, vector<8x256xf32>, vector<8x256xf32>, vector<8x256xf32>, vector<8x256xf32>, vector<8x256xf32>, vector<8x256xf32>, vector<8x256xf32> -> vector<72x256xf32>
    %cst_147 = arith.constant dense<0.000000e+00> : vector<8x256xf32>
    %227 = tpu.matmul %4, %226, %cst_147 {dimension_numbers = #tpu.dot_dimension_numbers<[1], [0], [0], [1], [0, 0, 1, 1], [], []>} : vector<8x72xf32>, vector<72x256xf32>, vector<8x256xf32> -> vector<8x256xf32>
    %cst_148 = arith.constant dense<0.000000e+00> : vector<8xf32>
    %228 = vector.multi_reduction <add>, %227, %cst_148 [1] : vector<8x256xf32> to vector<8xf32>
    %229 = vector.shape_cast %228 : vector<8xf32> to vector<8x1xf32>
    %230 = arith.mulf %227, %227 : vector<8x256xf32>
    %cst_149 = arith.constant dense<0.000000e+00> : vector<8xf32>
    %231 = vector.multi_reduction <add>, %230, %cst_149 [1] : vector<8x256xf32> to vector<8xf32>
    %232 = vector.shape_cast %231 : vector<8xf32> to vector<8x1xf32>
    %c4_i32_150 = arith.constant 4 : i32
    %233 = tpu.dynamic_rotate %229 by %c4_i32_150 dim 0 : vector<8x1xf32>, i32 -> vector<8x1xf32>
    %234 = arith.addf %229, %233 : vector<8x1xf32>
    %c4_i32_151 = arith.constant 4 : i32
    %235 = tpu.dynamic_rotate %232 by %c4_i32_151 dim 0 : vector<8x1xf32>, i32 -> vector<8x1xf32>
    %236 = arith.addf %232, %235 : vector<8x1xf32>
    %cst_152 = arith.constant 0.001953125 : f32
    %237 = vector.broadcast %cst_152 : f32 to vector<8x1xf32>
    %238 = arith.mulf %234, %237 : vector<8x1xf32>
    %cst_153 = arith.constant 0.001953125 : f32
    %239 = vector.broadcast %cst_153 : f32 to vector<8x1xf32>
    %240 = arith.mulf %236, %239 : vector<8x1xf32>
    %241 = arith.mulf %238, %238 : vector<8x1xf32>
    %242 = arith.subf %240, %241 : vector<8x1xf32>
    %cst_154 = arith.constant 9.99999974E-6 : f32
    %243 = vector.broadcast %cst_154 : f32 to vector<8x1xf32>
    %244 = arith.addf %242, %243 : vector<8x1xf32>
    %245 = math.rsqrt %244 : vector<8x1xf32>
    %246 = arith.mulf %8, %245 : vector<8x1xf32>
    %247 = arith.mulf %238, %246 : vector<8x1xf32>
    %248 = arith.subf %9, %247 : vector<8x1xf32>
    %249 = vector.broadcast %246 : vector<8x1xf32> to vector<8x256xf32>
    %250 = arith.mulf %227, %249 : vector<8x256xf32>
    %251 = vector.broadcast %248 : vector<8x1xf32> to vector<8x256xf32>
    %252 = arith.addf %250, %251 : vector<8x256xf32>
    %253 = arith.addf %252, %0 : vector<8x256xf32>
    %cst_155 = arith.constant 0.000000e+00 : f32
    %254 = vector.broadcast %cst_155 : f32 to vector<8x256xf32>
    %255 = arith.maximumf %253, %254 : vector<8x256xf32>
    %c0_156 = arith.constant 0 : index
    %c0_157 = arith.constant 0 : index
    %256 = vector.load %arg4[%c0_156, %c0_157] : memref<8x256xf32, #tpu.memory_space<vmem>>, vector<8x256xf32>
    tpu.vector_store %arg4[%c0_156, %c0_157], %255 {strides = array<i32>} : memref<8x256xf32, #tpu.memory_space<vmem>>, vector<8x256xf32>,
    return
  }
}

</mosaic_0001>

<bundles_post_ra>
// kernel: recurrent_residual_block.1
= control target key start
LH: loop header
LB: loop body
LE: loop exit
PB: predicated region body
PF: predicated region fallthrough
CT: control target
= control target key end

     0   :  { %s908_s17 = smov 16   ;;  %s909_s18 = smov 17   ;;  %v914_v2 = vmov 0.0   ;;  %v27_v3 = vlaneseq  ;;  %vm120_vm8 = vcmask 588800   ;;  %s1421_s0 = inlined_call_operand.vmem [shape: f32[8,256], index: 0, kind: input, shape index: {}]   ;;  %s1422_s2 = inlined_call_operand.vmem [shape: f32[9,8,256], index: 2, kind: input, shape index: {}]   ;;  %s1423_s1 = inlined_call_operand.vmem [shape: f32[2,8,72], index: 1, kind: input, shape index: {}]   ;;  %s1424_s3 = inlined_call_operand.vmem [shape: f32[8,4], index: 3, kind: input, shape index: {}]   ;;  %s1425_s4 = inlined_call_operand.vmem [shape: f32[8,256], index: 4, kind: output, shape index: {}]  }
   0x1   :  { %v952_v0 = vld [vmem:[%s1421_s0] sm:$0xff]  ;;  %v961_v1 = vld [vmem:[%s1421_s0 + $0x8] sm:$0xff]  ;;  %s910_s21 = smov 15   ;;  %s911_s22 = smov 1   ;;  %188 = vmatprep.mubr.f32.mxu0 %v914_v2  ;;  %367 = vmatprep.mubr.f32.mxu1 %v914_v2  ;;  %v999_v7 = vld [vmem:[%s1422_s2 + $0x10] sm:$0xff] }
   0x2   :  { %36 = vrot.lane.b32.xlu1 %v952_v0, %s908_s17  ;;  %23 = vrot.lane.b32.xlu0 %v952_v0, %s909_s18  ;;  %s912_s23 = smov 127   ;;  %s913_s24 = smov 113   ;;  %v993_v4 = vand.u32 127, %v27_v3  ;;  %v1005_v8 = vld [vmem:[%s1422_s2] sm:$0xff]  ;;  %v1010_v9 = vld [vmem:[%s1422_s2 + $0x8] sm:$0xff] }
   0x3   :  { %s915_s25 = smov 112   ;;  %s916_s26 = smov 111   ;;  %v1015_v10 = vld [vmem:[%s1422_s2 + $0x18] sm:$0xff]  ;;  %v1033_v25 = vld [vmem:[%s1422_s2 + $0x20] sm:$0xff]  ;;  %v1039_v26 = vld [vmem:[%s1422_s2 + $0x28] sm:$0xff] }
   0x4   :  { %vm40_vm0 = vcmp.lt.s32.totalorder %v993_v4, 16  ;;  %vm29_vm1 = vcmp.lt.s32.totalorder %v993_v4, 17  ;;  %vm52_vm2 = vcmp.lt.s32.totalorder %v993_v4, 15  ;;  %vm64_vm3 = vcmp.lt.s32.totalorder %v993_v4, 1  ;;  %v1048_v29 = vld [vmem:[%s1422_s2 + $0x30] sm:$0xff]  ;;  %v1053_v30 = vld [vmem:[%s1422_s2 + $0x38] sm:$0xff] }
   0x5   :  { %vm76_vm4 = vcmp.lt.s32.totalorder %v993_v4, 127  ;;  %v1067_v39 = vld [vmem:[%s1422_s2 + $0x50] sm:$0xff]  ;;  %v1072_v40 = vld [vmem:[%s1422_s2 + $0x58] sm:$0xff]  ;;  %vm88_vm5 = vcmp.lt.s32.totalorder %v993_v4, 113  ;;  %v1086_v53 = vld [vmem:[%s1422_s2 + $0x60] sm:$0xff]  ;;  %vm100_vm6 = vcmp.lt.s32.totalorder %v993_v4, 112 }
   0x6   :  { %38 = vrot.lane.b32.xlu1 %v961_v1, %s908_s17  ;;  %25 = vrot.lane.b32.xlu0 %v961_v1, %s909_s18  ;;  %v1092_v54 = vld [vmem:[%s1422_s2 + $0x68] sm:$0xff]  ;;  %v1101_v57 = vld [vmem:[%s1422_s2 + $0x70] sm:$0xff]  ;;  %vm112_vm7 = vcmp.lt.s32.totalorder %v993_v4, 111  ;;  %s921_s27 = smov 126   ;;  %s923_s28 = smov 3  }
   0x7   :  { %v1106_v58 = vld [vmem:[%s1422_s2 + $0x78] sm:$0xff] }
   0xa   :  { %50 = vrot.lane.b32.xlu1 %v961_v1, %s910_s21  ;;  %48 = vrot.lane.b32.xlu0 %v952_v0, %s910_s21 }
   0xe   :  { %62 = vrot.lane.b32.xlu1 %v961_v1, %s911_s22  ;;  %60 = vrot.lane.b32.xlu0 %v952_v0, %s911_s22 }
  0x12   :  { %74 = vrot.lane.b32.xlu1 %v961_v1, %s912_s23  ;;  %72 = vrot.lane.b32.xlu0 %v952_v0, %s912_s23 }
  0x16   :  { %86 = vrot.lane.b32.xlu1 %v961_v1, %s913_s24  ;;  %84 = vrot.lane.b32.xlu0 %v952_v0, %s913_s24 }
  0x1a   :  { %98 = vrot.lane.b32.xlu1 %v961_v1, %s915_s25  ;;  %96 = vrot.lane.b32.xlu0 %v952_v0, %s915_s25 }
  0x1e   :  { %110 = vrot.lane.b32.xlu1 %v961_v1, %s916_s26  ;;  %108 = vrot.lane.b32.xlu0 %v952_v0, %s916_s26 }
  0x74   :  { %v37_v5 = vpop.permute.xlu1 %36  ;;  %v24_v6 = vpop.permute.xlu0 %23 }
  0x78   :  { %v39_v11 = vpop.permute.xlu1 %38  ;;  %v26_v12 = vpop.permute.xlu0 %25 }
  0x79   :  { %v41_v13 = vsel %vm40_vm0, %v37_v5, %v39_v11  ;;  %v42_v14 = vsel %vm40_vm0, %v39_v11, %v37_v5  ;;  %v30_v15 = vsel %vm29_vm1, %v24_v6, %v26_v12  ;;  %v31_v16 = vsel %vm29_vm1, %v26_v12, %v24_v6  ;;  %v1120_v11 = vld [vmem:[%s1422_s2 + $0x88] sm:$0xff] }
  0x7a   :  { %v46_v17 = vmul.f32 %v999_v7, %v42_v14  ;;  %v34_v18 = vmul.f32 %v1005_v8, %v31_v16  ;;  %v35_v19 = vmul.f32 %v1010_v9, %v30_v15  ;;  %v47_v20 = vmul.f32 %v1015_v10, %v41_v13  ;;  %v1125_v14 = vld [vmem:[%s1422_s2 + $0x80] sm:$0xff] }
  0x7c   :  { %v51_v21 = vpop.permute.xlu1 %50  ;;  %v49_v22 = vpop.permute.xlu0 %48  ;;  %v810_v23 = vpack.c.bf16 %v47_v20, %v35_v19  ;;  %v812_v24 = vpack.c.bf16 %v46_v17, %v34_v18 }
  0x7d   :  { %v53_v27 = vsel %vm52_vm2, %v49_v22, %v51_v21  ;;  %v54_v28 = vsel %vm52_vm2, %v51_v21, %v49_v22  ;;  %v1136_v21 = vld [vmem:[%s1423_s1] sm:$0xff] }
  0x7e   :  { %811 = vmatprep.subr.bf16.mxu0 %v810_v23  ;;  %v58_v35 = vmul.f32 %v1033_v25, %v54_v28  ;;  %v59_v36 = vmul.f32 %v1039_v26, %v53_v27 }
  0x7f   :  { %813 = vmatpush1.bf16.msra.mxu0 %v812_v24 }
  0x80   :  { %v63_v31 = vpop.permute.xlu1 %62  ;;  %v61_v32 = vpop.permute.xlu0 %60 }
  0x81   :  { %v65_v33 = vsel %vm64_vm3, %v61_v32, %v63_v31  ;;  %v66_v34 = vsel %vm64_vm3, %v63_v31, %v61_v32  ;;  %v917_v32 = vmov 0  }
  0x82   :  { %v70_v37 = vmul.f32 %v1048_v29, %v66_v34  ;;  %v71_v38 = vmul.f32 %v1053_v30, %v65_v33  ;;  %890 = vset.pattern.permute.xlu1 %v917_v32 }
  0x84   :  { %v75_v41 = vpop.permute.xlu1 %74  ;;  %v73_v42 = vpop.permute.xlu0 %72  ;;  %v814_v43 = vpack.c.bf16 %v71_v38, %v59_v36  ;;  %v816_v44 = vpack.c.bf16 %v70_v37, %v58_v35 }
  0x85   :  { %v77_v45 = vsel %vm76_vm4, %v73_v42, %v75_v41  ;;  %v78_v46 = vsel %vm76_vm4, %v75_v41, %v73_v42 }
  0x86   :  { %v82_v47 = vmul.f32 %v1067_v39, %v77_v45  ;;  %v83_v48 = vmul.f32 %v1072_v40, %v78_v46  ;;  %815 = vmatprep.subr.bf16.mxu0 %v814_v43  ;;  %v918_v46 = vmov 1  }
  0x87   :  { %817 = vmatpush1.bf16.msra.mxu0 %v816_v44  ;;  %891 = vset.pattern.permute.xlu0 %v918_v46 }
  0x88   :  { %v87_v49 = vpop.permute.xlu1 %86  ;;  %v85_v50 = vpop.permute.xlu0 %84  ;;  %v818_v51 = vpack.c.bf16 %v83_v48, %v961_v1  ;;  %v820_v52 = vpack.c.bf16 %v82_v47, %v952_v0  ;;  %v1146_v47 = vld [vmem:[%s1424_s3] sm:$0xff] }
  0x89   :  { %v89_v55 = vsel %vm88_vm5, %v85_v50, %v87_v49  ;;  %v90_v56 = vsel %vm88_vm5, %v87_v49, %v85_v50 }
  0x8a   :  { %819 = vmatprep.subr.bf16.mxu0 %v818_v51  ;;  %v94_v63 = vmul.f32 %v1086_v53, %v89_v55  ;;  %v95_v3 = vmul.f32 %v1092_v54, %v90_v56 }
  0x8b   :  { %821 = vmatpush1.bf16.msra.mxu0 %v820_v52 }
  0x8c   :  { %v99_v59 = vpop.permute.xlu1 %98  ;;  %v97_v60 = vpop.permute.xlu0 %96 }
  0x8d   :  { %v101_v61 = vsel %vm100_vm6, %v97_v60, %v99_v59  ;;  %v102_v62 = vsel %vm100_vm6, %v99_v59, %v97_v60 }
  0x8e   :  { %v106_v5 = vmul.f32 %v1101_v57, %v101_v61  ;;  %v107_v6 = vmul.f32 %v1106_v58, %v102_v62 }
  0x90   :  { %v111_v12 = vpop.permute.xlu1 %110  ;;  %v822_v13 = vpack.c.bf16 %v107_v6, %v95_v3  ;;  %v109_v15 = vpop.permute.xlu0 %108  ;;  %v824_v16 = vpack.c.bf16 %v106_v5, %v94_v63 }
  0x91   :  { %v113_v17 = vsel %vm112_vm7, %v109_v15, %v111_v12  ;;  %v114_v18 = vsel %vm112_vm7, %v111_v12, %v109_v15 }
  0x92   :  { %823 = vmatprep.subr.bf16.mxu0 %v822_v13  ;;  %v119_v19 = vmul.f32 %v1120_v11, %v114_v18  ;;  %v118_v20 = vmul.f32 %v1125_v14, %v113_v17 }
  0x93   :  { %825 = vmatpush1.bf16.msra.mxu0 %v824_v16 }
  0x94   :  { %140 = vmatprep.subr.mxu0 %v119_v19 }
  0x97   :  { %141 = vmatpush1.msra.mxu0 %v118_v20 }
  0x98   :  { %806 = vmatmul.mubr.msk.f32.vlgmr.msra.gmra.mrb[0].mxu0 %vm120_vm8, %v1136_v21 }
  0x99   :  { %552 = vmatprep.mubr.f32.mxu0 %v914_v2 }
 0x16b   :  { %v190_v22 = vpop.f32.mrb[0].mxu0 }
 0x16c   :  { %v192_v23 = vpop.f32.mrb[1].mxu0  ;;  %v198_v24 = vmul.f32 %v190_v22, %v190_v22 }
 0x16d   :  { %v195_v27 = vadd.f32 %v192_v23, %v190_v22  ;;  %v199_v28 = vmul.f32 %v192_v23, %v192_v23 }
 0x16f   :  { %196 = vadd.xlane.f32.xlu0 %v195_v27  ;;  %v200_v31 = vadd.f32 %v199_v28, %v198_v24 }
 0x171   :  { %201 = vadd.xlane.f32.xlu1 %v200_v31 }
 0x1fc   :  { %v197_v33 = vpop.xlane.xlu0 %196 }
 0x1fd   :  { %v203_v34 = vrot.slane %v197_v33, 4 }
 0x1fe   :  { %v202_v35 = vpop.xlane.xlu1 %201 }
 0x1ff   :  { %v204_v36 = vadd.f32 %v203_v34, %v197_v33  ;;  %v205_v37 = vrot.slane %v202_v35, 4 }
 0x201   :  { %v207_v38 = vmul.f32 0.001953125, %v204_v36  ;;  %v206_v41 = vadd.f32 %v205_v37, %v202_v35 }
 0x203   :  { %v209_v42 = vmul.f32 %v207_v38, %v207_v38  ;;  %v208_v43 = vmul.f32 0.001953125, %v206_v41 }
 0x205   :  { %v210_v44 = vsub.f32 %v208_v43, %v209_v42 }
 0x207   :  { %v211_v45 = vadd.f32 1e-05, %v210_v44 }
 0x209   :  { %898 = vrsqrt.f32 %v211_v45 }
 0x213   :  { %v899_v48 = vpop.eup %898 }
 0x214   :  { %v213_v49 = vmul.f32 %v899_v48, %v1146_v47 }
 0x216   :  { %222 = vperm.xlu1 %890, %v213_v49   ;;  %v214_v50 = vmul.f32 %v213_v49, %v207_v38 }
 0x218   :  { %216 = vrot.lane.b32.xlu0 %v214_v50, %s911_s22 }
 0x28a   :  { %v217_v51 = vpop.permute.xlu0 %216 }
 0x28b   :  { %v219_v52 = vsub.f32 %v1146_v47, %v217_v51 }
 0x28d   :  { %229 = vperm.xlu0 %891, %v219_v52  }
 0x295   :  { %v223_v55 = vpop.permute.xlu1 %222 }
 0x296   :  { %v225_v56 = vmul.f32 %v223_v55, %v190_v22  ;;  %v226_v60 = vmul.f32 %v223_v55, %v192_v23 }
 0x30c   :  { %v230_v59 = vpop.permute.xlu0 %229 }
 0x30d   :  { %v232_v61 = vadd.f32 %v230_v59, %v225_v56  ;;  %v233_v62 = vadd.f32 %v230_v59, %v226_v60 }
 0x30f   :  { %v1151_v63 = vmax.f32 %v232_v61, 0.0  ;;  %v235_v3 = vmax.f32 %v233_v62, 0.0 }
 0x311   :  { %244 = vrot.lane.b32.xlu0 %v1151_v63, %s908_s17  ;;  %236 = vrot.lane.b32.xlu1 %v1151_v63, %s909_s18 }
 0x315   :  { %252 = vrot.lane.b32.xlu0 %v1151_v63, %s910_s21  ;;  %238 = vrot.lane.b32.xlu1 %v235_v3, %s909_s18 }
 0x319   :  { %260 = vrot.lane.b32.xlu0 %v1151_v63, %s911_s22  ;;  %246 = vrot.lane.b32.xlu1 %v235_v3, %s908_s17 }
 0x31d   :  { %268 = vrot.lane.b32.xlu0 %v1151_v63, %s912_s23  ;;  %254 = vrot.lane.b32.xlu1 %v235_v3, %s910_s21 }
 0x321   :  { %276 = vrot.lane.b32.xlu0 %v1151_v63, %s913_s24  ;;  %262 = vrot.lane.b32.xlu1 %v235_v3, %s911_s22 }
 0x325   :  { %284 = vrot.lane.b32.xlu0 %v1151_v63, %s915_s25  ;;  %270 = vrot.lane.b32.xlu1 %v235_v3, %s912_s23 }
 0x329   :  { %292 = vrot.lane.b32.xlu0 %v1151_v63, %s916_s26  ;;  %278 = vrot.lane.b32.xlu1 %v235_v3, %s913_s24 }
 0x32d   :  { %286 = vrot.lane.b32.xlu1 %v235_v3, %s915_s25 }
 0x331   :  { %294 = vrot.lane.b32.xlu1 %v235_v3, %s916_s26 }
 0x383   :  { %v245_v5 = vpop.permute.xlu0 %244  ;;  %v237_v6 = vpop.permute.xlu1 %236 }
 0x387   :  { %v253_v12 = vpop.permute.xlu0 %252  ;;  %v239_v13 = vpop.permute.xlu1 %238 }
 0x388   :  { %v240_v15 = vsel %vm29_vm1, %v237_v6, %v239_v13  ;;  %v241_v16 = vsel %vm29_vm1, %v239_v13, %v237_v6 }
 0x389   :  { %v242_v22 = vmul.f32 %v241_v16, %v1005_v8  ;;  %v243_v24 = vmul.f32 %v240_v15, %v1010_v9 }
 0x38b   :  { %v261_v17 = vpop.permute.xlu0 %260  ;;  %v247_v18 = vpop.permute.xlu1 %246 }
 0x38c   :  { %v248_v19 = vsel %vm40_vm0, %v245_v5, %v247_v18  ;;  %v249_v20 = vsel %vm40_vm0, %v247_v18, %v245_v5 }
 0x38d   :  { %v250_v23 = vmul.f32 %v999_v7, %v249_v20  ;;  %v251_v27 = vmul.f32 %v1015_v10, %v248_v19 }
 0x38f   :  { %v255_v28 = vpop.permute.xlu1 %254  ;;  %v826_v31 = vpack.c.bf16 %v251_v27, %v243_v24  ;;  %v828_v33 = vpack.c.bf16 %v250_v23, %v242_v22  ;;  %v269_v34 = vpop.permute.xlu0 %268 }
 0x390   :  { %v256_v35 = vsel %vm52_vm2, %v253_v12, %v255_v28  ;;  %v257_v36 = vsel %vm52_vm2, %v255_v28, %v253_v12 }
 0x391   :  { %827 = vmatprep.subr.bf16.mxu1 %v826_v31  ;;  %v258_v42 = vmul.f32 %v1033_v25, %v257_v36  ;;  %v259_v43 = vmul.f32 %v1039_v26, %v256_v35 }
 0x392   :  { %829 = vmatpush1.bf16.msra.mxu1 %v828_v33  ;;  %v1229_v33 = vld [vmem:[%s1423_s1 + $0x8] sm:$0xff]  ;;  %s920_s1 = smov 2  }
 0x393   :  { %v263_v37 = vpop.permute.xlu1 %262  ;;  %v277_v48 = vpop.permute.xlu0 %276 }
 0x394   :  { %v264_v38 = vsel %vm64_vm3, %v261_v17, %v263_v37  ;;  %v265_v41 = vsel %vm64_vm3, %v263_v37, %v261_v17 }
 0x395   :  { %v266_v44 = vmul.f32 %v1048_v29, %v265_v41  ;;  %v267_v45 = vmul.f32 %v1053_v30, %v264_v38 }
 0x397   :  { %v271_v49 = vpop.permute.xlu1 %270  ;;  %v830_v50 = vpack.c.bf16 %v267_v45, %v259_v43  ;;  %v832_v51 = vpack.c.bf16 %v266_v44, %v258_v42  ;;  %v285_v5 = vpop.permute.xlu0 %284 }
 0x398   :  { %v272_v52 = vsel %vm76_vm4, %v269_v34, %v271_v49  ;;  %v273_v55 = vsel %vm76_vm4, %v271_v49, %v269_v34 }
 0x399   :  { %v274_v56 = vmul.f32 %v1067_v39, %v272_v52  ;;  %v275_v59 = vmul.f32 %v1072_v40, %v273_v55  ;;  %831 = vmatprep.subr.bf16.mxu1 %v830_v50 }
 0x39a   :  { %833 = vmatpush1.bf16.msra.mxu1 %v832_v51 }
 0x39b   :  { %v279_v60 = vpop.permute.xlu1 %278  ;;  %v834_v61 = vpack.c.bf16 %v275_v59, %v235_v3  ;;  %v836_v62 = vpack.c.bf16 %v274_v56, %v1151_v63  ;;  %v293_v19 = vpop.permute.xlu0 %292 }
 0x39c   :  { %v280_v6 = vsel %vm88_vm5, %v277_v48, %v279_v60  ;;  %v281_v12 = vsel %vm88_vm5, %v279_v60, %v277_v48 }
 0x39d   :  { %835 = vmatprep.subr.bf16.mxu1 %v834_v61  ;;  %v282_v3 = vmul.f32 %v1086_v53, %v280_v6  ;;  %v283_v63 = vmul.f32 %v1092_v54, %v281_v12 }
 0x39e   :  { %837 = vmatpush1.bf16.msra.mxu1 %v836_v62  ;;  %v922_v62 = vmov 3  }
 0x39f   :  { %v287_v13 = vpop.permute.xlu1 %286  ;;  %893 = vset.pattern.permute.xlu0 %v922_v62 }
 0x3a0   :  { %v288_v15 = vsel %vm100_vm6, %v285_v5, %v287_v13  ;;  %v289_v16 = vsel %vm100_vm6, %v287_v13, %v285_v5 }
 0x3a1   :  { %v290_v17 = vmul.f32 %v1101_v57, %v288_v15  ;;  %v291_v18 = vmul.f32 %v1106_v58, %v289_v16 }
 0x3a3   :  { %v295_v20 = vpop.permute.xlu1 %294  ;;  %v838_v22 = vpack.c.bf16 %v291_v18, %v283_v63  ;;  %v840_v23 = vpack.c.bf16 %v290_v17, %v282_v3 }
 0x3a4   :  { %v297_v24 = vsel %vm112_vm7, %v295_v20, %v293_v19  ;;  %v296_v27 = vsel %vm112_vm7, %v293_v19, %v295_v20 }
 0x3a5   :  { %v299_v28 = vmul.f32 %v1120_v11, %v297_v24  ;;  %839 = vmatprep.subr.bf16.mxu1 %v838_v22  ;;  %v298_v31 = vmul.f32 %v1125_v14, %v296_v27 }
 0x3a6   :  { %841 = vmatpush1.bf16.msra.mxu1 %v840_v23 }
 0x3a7   :  { %319 = vmatprep.subr.mxu1 %v299_v28 }
 0x3aa   :  { %320 = vmatpush1.msra.mxu1 %v298_v31 }
 0x3ab   :  { %807 = vmatmul.mubr.msk.f32.vlgmr.msra.gmra.mrb[0].mxu1 %vm120_vm8, %v1229_v33 }
 0x3ac   :  { %728 = vmatprep.mubr.f32.mxu1 %v914_v2  ;;  %v919_v2 = vmov 2  }
 0x3ad   :  { %892 = vset.pattern.permute.xlu1 %v919_v2 }
 0x47e   :  { %v369_v34 = vpop.f32.mrb[0].mxu1 }
 0x47f   :  { %v371_v35 = vpop.f32.mrb[1].mxu1  ;;  %v377_v36 = vmul.f32 %v369_v34, %v369_v34 }
 0x480   :  { %v374_v37 = vadd.f32 %v371_v35, %v369_v34  ;;  %v378_v38 = vmul.f32 %v371_v35, %v371_v35 }
 0x482   :  { %375 = vadd.xlane.f32.xlu0 %v374_v37  ;;  %v379_v41 = vadd.f32 %v378_v38, %v377_v36 }
 0x484   :  { %380 = vadd.xlane.f32.xlu1 %v379_v41 }
 0x50f   :  { %v376_v42 = vpop.xlane.xlu0 %375 }
 0x510   :  { %v382_v43 = vrot.slane %v376_v42, 4 }
 0x511   :  { %v381_v44 = vpop.xlane.xlu1 %380 }
 0x512   :  { %v383_v45 = vadd.f32 %v382_v43, %v376_v42  ;;  %v384_v48 = vrot.slane %v381_v44, 4 }
 0x514   :  { %v386_v49 = vmul.f32 0.001953125, %v383_v45  ;;  %v385_v50 = vadd.f32 %v384_v48, %v381_v44 }
 0x516   :  { %v388_v51 = vmul.f32 %v386_v49, %v386_v49  ;;  %v387_v52 = vmul.f32 0.001953125, %v385_v50 }
 0x518   :  { %v389_v55 = vsub.f32 %v387_v52, %v388_v51 }
 0x51a   :  { %v390_v56 = vadd.f32 1e-05, %v389_v55 }
 0x51c   :  { %900 = vrsqrt.f32 %v390_v56 }
 0x526   :  { %v901_v59 = vpop.eup %900 }
 0x527   :  { %393 = vrot.lane.b32.xlu0 %v901_v59, %s920_s1 }
 0x599   :  { %v394_v60 = vpop.permute.xlu0 %393 }
 0x59a   :  { %v396_v61 = vmul.f32 %v394_v60, %v1146_v47 }
 0x59c   :  { %398 = vrot.lane.b32.xlu1 %v396_v61, %s921_s27 }
 0x5a0   :  { %408 = vperm.xlu1 %892, %v396_v61  }
 0x5a4   :  { %894 = vset.pattern.permute.xlu1 %v917_v32 }
 0x60e   :  { %v399_v5 = vpop.permute.xlu1 %398 }
 0x60f   :  { %v401_v6 = vmul.f32 %v399_v5, %v386_v49 }
 0x611   :  { %403 = vrot.lane.b32.xlu0 %v401_v6, %s923_s28 }
 0x61f   :  { %v409_v15 = vpop.permute.xlu1 %408 }
 0x620   :  { %v411_v16 = vmul.f32 %v409_v15, %v369_v34  ;;  %v412_v3 = vmul.f32 %v409_v15, %v371_v35 }
 0x683   :  { %v404_v12 = vpop.permute.xlu0 %403 }
 0x684   :  { %v406_v13 = vsub.f32 %v1146_v47, %v404_v12 }
 0x686   :  { %415 = vperm.xlu0 %893, %v406_v13  }
 0x68a   :  { %895 = vset.pattern.permute.xlu0 %v918_v46 }
 0x705   :  { %v416_v63 = vpop.permute.xlu0 %415 }
 0x706   :  { %v418_v17 = vadd.f32 %v416_v63, %v411_v16  ;;  %v419_v32 = vadd.f32 %v416_v63, %v412_v3 }
 0x708   :  { %v420_v18 = vadd.f32 %v418_v17, %v952_v0  ;;  %v421_v19 = vadd.f32 %v419_v32, %v961_v1 }
 0x70a   :  { %v1245_v20 = vmax.f32 %v420_v18, 0.0  ;;  %v423_v22 = vmax.f32 %v421_v19, 0.0 }
 0x70c   :  { %432 = vrot.lane.b32.xlu0 %v1245_v20, %s908_s17  ;;  %424 = vrot.lane.b32.xlu1 %v1245_v20, %s909_s18 }
 0x710   :  { %440 = vrot.lane.b32.xlu0 %v1245_v20, %s910_s21  ;;  %426 = vrot.lane.b32.xlu1 %v423_v22, %s909_s18 }
 0x714   :  { %448 = vrot.lane.b32.xlu0 %v1245_v20, %s911_s22  ;;  %434 = vrot.lane.b32.xlu1 %v423_v22, %s908_s17 }
 0x718   :  { %456 = vrot.lane.b32.xlu0 %v1245_v20, %s912_s23  ;;  %442 = vrot.lane.b32.xlu1 %v423_v22, %s910_s21 }
 0x71c   :  { %464 = vrot.lane.b32.xlu0 %v1245_v20, %s913_s24  ;;  %450 = vrot.lane.b32.xlu1 %v423_v22, %s911_s22 }
 0x720   :  { %472 = vrot.lane.b32.xlu0 %v1245_v20, %s915_s25  ;;  %458 = vrot.lane.b32.xlu1 %v423_v22, %s912_s23 }
 0x724   :  { %480 = vrot.lane.b32.xlu0 %v1245_v20, %s916_s26  ;;  %466 = vrot.lane.b32.xlu1 %v423_v22, %s913_s24 }
 0x728   :  { %474 = vrot.lane.b32.xlu1 %v423_v22, %s915_s25 }
 0x72c   :  { %482 = vrot.lane.b32.xlu1 %v423_v22, %s916_s26 }
 0x77e   :  { %v433_v0 = vpop.permute.xlu0 %432  ;;  %v425_v1 = vpop.permute.xlu1 %424 }
 0x782   :  { %v441_v46 = vpop.permute.xlu0 %440  ;;  %v427_v23 = vpop.permute.xlu1 %426 }
 0x783   :  { %v428_v24 = vsel %vm29_vm1, %v425_v1, %v427_v23  ;;  %v429_v27 = vsel %vm29_vm1, %v427_v23, %v425_v1 }
 0x784   :  { %v430_v36 = vmul.f32 %v429_v27, %v1005_v8  ;;  %v431_v37 = vmul.f32 %v428_v24, %v1010_v9 }
 0x786   :  { %v449_v28 = vpop.permute.xlu0 %448  ;;  %v435_v31 = vpop.permute.xlu1 %434 }
 0x787   :  { %v436_v34 = vsel %vm40_vm0, %v433_v0, %v435_v31  ;;  %v437_v35 = vsel %vm40_vm0, %v435_v31, %v433_v0 }
 0x788   :  { %v438_v38 = vmul.f32 %v999_v7, %v437_v35  ;;  %v439_v41 = vmul.f32 %v1015_v10, %v436_v34 }
 0x78a   :  { %v844_v42 = vpack.c.bf16 %v438_v38, %v430_v36  ;;  %v443_v43 = vpop.permute.xlu1 %442  ;;  %v842_v44 = vpack.c.bf16 %v439_v41, %v431_v37  ;;  %v457_v45 = vpop.permute.xlu0 %456 }
 0x78b   :  { %v444_v48 = vsel %vm52_vm2, %v441_v46, %v443_v43  ;;  %v445_v49 = vsel %vm52_vm2, %v443_v43, %v441_v46 }
 0x78c   :  { %843 = vmatprep.subr.bf16.mxu0 %v842_v44  ;;  %v446_v55 = vmul.f32 %v1033_v25, %v445_v49  ;;  %v447_v56 = vmul.f32 %v1039_v26, %v444_v48 }
 0x78d   :  { %845 = vmatpush1.bf16.msra.mxu0 %v844_v42 }
 0x78e   :  { %v451_v50 = vpop.permute.xlu1 %450  ;;  %v465_v61 = vpop.permute.xlu0 %464 }
 0x78f   :  { %v452_v51 = vsel %vm64_vm3, %v449_v28, %v451_v50  ;;  %v453_v52 = vsel %vm64_vm3, %v451_v50, %v449_v28 }
 0x790   :  { %v454_v59 = vmul.f32 %v1048_v29, %v453_v52  ;;  %v455_v60 = vmul.f32 %v1053_v30, %v452_v51 }
 0x792   :  { %v848_v5 = vpack.c.bf16 %v454_v59, %v446_v55  ;;  %v459_v6 = vpop.permute.xlu1 %458  ;;  %v846_v12 = vpack.c.bf16 %v455_v60, %v447_v56  ;;  %v473_v18 = vpop.permute.xlu0 %472 }
 0x793   :  { %v460_v13 = vsel %vm76_vm4, %v457_v45, %v459_v6  ;;  %v461_v15 = vsel %vm76_vm4, %v459_v6, %v457_v45 }
 0x794   :  { %v462_v16 = vmul.f32 %v1067_v39, %v460_v13  ;;  %v463_v3 = vmul.f32 %v1072_v40, %v461_v15  ;;  %847 = vmatprep.subr.bf16.mxu0 %v846_v12 }
 0x795   :  { %849 = vmatpush1.bf16.msra.mxu0 %v848_v5 }
 0x796   :  { %v852_v63 = vpack.c.bf16 %v462_v16, %v1245_v20  ;;  %v467_v17 = vpop.permute.xlu1 %466  ;;  %v850_v32 = vpack.c.bf16 %v463_v3, %v423_v22  ;;  %v481_v28 = vpop.permute.xlu0 %480 }
 0x797   :  { %v468_v19 = vsel %vm88_vm5, %v465_v61, %v467_v17  ;;  %v469_v0 = vsel %vm88_vm5, %v467_v17, %v465_v61 }
 0x798   :  { %851 = vmatprep.subr.bf16.mxu0 %v850_v32  ;;  %v470_v20 = vmul.f32 %v1086_v53, %v468_v19  ;;  %v471_v22 = vmul.f32 %v1092_v54, %v469_v0 }
 0x799   :  { %853 = vmatpush1.bf16.msra.mxu0 %v852_v63 }
 0x79a   :  { %v475_v1 = vpop.permute.xlu1 %474 }
 0x79b   :  { %v476_v46 = vsel %vm100_vm6, %v473_v18, %v475_v1  ;;  %v477_v23 = vsel %vm100_vm6, %v475_v1, %v473_v18 }
 0x79c   :  { %v478_v24 = vmul.f32 %v1101_v57, %v476_v46  ;;  %v479_v27 = vmul.f32 %v1106_v58, %v477_v23 }
 0x79e   :  { %v856_v31 = vpack.c.bf16 %v478_v24, %v470_v20  ;;  %v483_v34 = vpop.permute.xlu1 %482  ;;  %v854_v35 = vpack.c.bf16 %v479_v27, %v471_v22 }
 0x79f   :  { %v485_v36 = vsel %vm112_vm7, %v483_v34, %v481_v28  ;;  %v484_v37 = vsel %vm112_vm7, %v481_v28, %v483_v34 }
 0x7a0   :  { %v487_v38 = vmul.f32 %v1120_v11, %v485_v36  ;;  %855 = vmatprep.subr.bf16.mxu0 %v854_v35  ;;  %v486_v41 = vmul.f32 %v1125_v14, %v484_v37 }
 0x7a1   :  { %857 = vmatpush1.bf16.msra.mxu0 %v856_v31 }
 0x7a2   :  { %504 = vmatprep.subr.mxu0 %v487_v38 }
 0x7a5   :  { %505 = vmatpush1.msra.mxu0 %v486_v41 }
 0x7a6   :  { %808 = vmatmul.mubr.msk.f32.vlgmr.msra.gmra.mrb[2].mxu0 %vm120_vm8, %v1136_v21 }
 0x879   :  { %v554_v42 = vpop.f32.mrb[2].mxu0 }
 0x87a   :  { %v556_v43 = vpop.f32.mrb[3].mxu0  ;;  %v562_v44 = vmul.f32 %v554_v42, %v554_v42 }
 0x87b   :  { %v563_v45 = vmul.f32 %v556_v43, %v556_v43  ;;  %v559_v48 = vadd.f32 %v556_v43, %v554_v42 }
 0x87d   :  { %560 = vadd.xlane.f32.xlu0 %v559_v48  ;;  %v564_v49 = vadd.f32 %v563_v45, %v562_v44 }
 0x87f   :  { %565 = vadd.xlane.f32.xlu1 %v564_v49 }
 0x90a   :  { %v561_v50 = vpop.xlane.xlu0 %560 }
 0x90b   :  { %v567_v51 = vrot.slane %v561_v50, 4 }
 0x90c   :  { %v566_v52 = vpop.xlane.xlu1 %565 }
 0x90d   :  { %v568_v55 = vadd.f32 %v567_v51, %v561_v50  ;;  %v569_v56 = vrot.slane %v566_v52, 4 }
 0x90f   :  { %v571_v59 = vmul.f32 0.001953125, %v568_v55  ;;  %v570_v60 = vadd.f32 %v569_v56, %v566_v52 }
 0x911   :  { %v573_v61 = vmul.f32 %v571_v59, %v571_v59  ;;  %v572_v5 = vmul.f32 0.001953125, %v570_v60 }
 0x913   :  { %v574_v6 = vsub.f32 %v572_v5, %v573_v61 }
 0x915   :  { %v575_v12 = vadd.f32 1e-05, %v574_v6 }
 0x917   :  { %902 = vrsqrt.f32 %v575_v12 }
 0x921   :  { %v903_v21 = vpop.eup %902 }
 0x922   :  { %v577_v13 = vmul.f32 %v903_v21, %v1146_v47 }
 0x924   :  { %586 = vperm.xlu1 %894, %v577_v13   ;;  %v578_v15 = vmul.f32 %v577_v13, %v571_v59 }
 0x926   :  { %580 = vrot.lane.b32.xlu0 %v578_v15, %s911_s22 }
 0x928   :  { %896 = vset.pattern.permute.xlu1 %v919_v2 }
 0x998   :  { %v581_v16 = vpop.permute.xlu0 %580 }
 0x999   :  { %v583_v3 = vsub.f32 %v1146_v47, %v581_v16 }
 0x99b   :  { %593 = vperm.xlu0 %895, %v583_v3  }
 0x99f   :  { %897 = vset.pattern.permute.xlu0 %v922_v62 }
 0x9a3   :  { %v587_v63 = vpop.permute.xlu1 %586 }
 0x9a4   :  { %v589_v17 = vmul.f32 %v587_v63, %v554_v42  ;;  %v590_v18 = vmul.f32 %v587_v63, %v556_v43 }
 0xa1a   :  { %v594_v32 = vpop.permute.xlu0 %593 }
 0xa1b   :  { %v596_v19 = vadd.f32 %v594_v32, %v589_v17  ;;  %v597_v0 = vadd.f32 %v594_v32, %v590_v18 }
 0xa1d   :  { %v1327_v1 = vmax.f32 %v596_v19, 0.0  ;;  %v599_v2 = vmax.f32 %v597_v0, 0.0 }
 0xa1f   :  { %608 = vrot.lane.b32.xlu0 %v1327_v1, %s908_s17  ;;  %600 = vrot.lane.b32.xlu1 %v1327_v1, %s909_s18 }
 0xa23   :  { %616 = vrot.lane.b32.xlu0 %v1327_v1, %s910_s21  ;;  %602 = vrot.lane.b32.xlu1 %v599_v2, %s909_s18 }
 0xa27   :  { %624 = vrot.lane.b32.xlu0 %v1327_v1, %s911_s22  ;;  %610 = vrot.lane.b32.xlu1 %v599_v2, %s908_s17 }
 0xa2b   :  { %632 = vrot.lane.b32.xlu0 %v1327_v1, %s912_s23  ;;  %618 = vrot.lane.b32.xlu1 %v599_v2, %s910_s21 }
 0xa2f   :  { %640 = vrot.lane.b32.xlu0 %v1327_v1, %s913_s24  ;;  %626 = vrot.lane.b32.xlu1 %v599_v2, %s911_s22 }
 0xa33   :  { %648 = vrot.lane.b32.xlu0 %v1327_v1, %s915_s25  ;;  %634 = vrot.lane.b32.xlu1 %v599_v2, %s912_s23 }
 0xa37   :  { %656 = vrot.lane.b32.xlu0 %v1327_v1, %s916_s26  ;;  %642 = vrot.lane.b32.xlu1 %v599_v2, %s913_s24 }
 0xa3b   :  { %650 = vrot.lane.b32.xlu1 %v599_v2, %s915_s25 }
 0xa3f   :  { %658 = vrot.lane.b32.xlu1 %v599_v2, %s916_s26 }
 0xa91   :  { %v609_v62 = vpop.permute.xlu0 %608  ;;  %v601_v46 = vpop.permute.xlu1 %600 }
 0xa95   :  { %v617_v23 = vpop.permute.xlu0 %616  ;;  %v603_v20 = vpop.permute.xlu1 %602 }
 0xa96   :  { %v604_v22 = vsel %vm29_vm1, %v601_v46, %v603_v20  ;;  %v605_v24 = vsel %vm29_vm1, %v603_v20, %v601_v46 }
 0xa97   :  { %v606_v35 = vmul.f32 %v605_v24, %v1005_v8  ;;  %v607_v36 = vmul.f32 %v604_v22, %v1010_v9 }
 0xa99   :  { %v625_v27 = vpop.permute.xlu0 %624  ;;  %v611_v28 = vpop.permute.xlu1 %610 }
 0xa9a   :  { %v612_v31 = vsel %vm40_vm0, %v609_v62, %v611_v28  ;;  %v613_v34 = vsel %vm40_vm0, %v611_v28, %v609_v62 }
 0xa9b   :  { %v614_v37 = vmul.f32 %v999_v7, %v613_v34  ;;  %v615_v38 = vmul.f32 %v1015_v10, %v612_v31 }
 0xa9d   :  { %v860_v41 = vpack.c.bf16 %v614_v37, %v606_v35  ;;  %v619_v42 = vpop.permute.xlu1 %618  ;;  %v858_v43 = vpack.c.bf16 %v615_v38, %v607_v36  ;;  %v633_v44 = vpop.permute.xlu0 %632 }
 0xa9e   :  { %v620_v45 = vsel %vm52_vm2, %v617_v23, %v619_v42  ;;  %v621_v48 = vsel %vm52_vm2, %v619_v42, %v617_v23 }
 0xa9f   :  { %859 = vmatprep.subr.bf16.mxu1 %v858_v43  ;;  %v622_v9 = vmul.f32 %v1033_v25, %v621_v48  ;;  %v623_v10 = vmul.f32 %v1039_v26, %v620_v45 }
 0xaa0   :  { %861 = vmatpush1.bf16.msra.mxu1 %v860_v41 }
 0xaa1   :  { %v627_v49 = vpop.permute.xlu1 %626  ;;  %v641_v52 = vpop.permute.xlu0 %640 }
 0xaa2   :  { %v628_v8 = vsel %vm64_vm3, %v625_v27, %v627_v49  ;;  %v629_v7 = vsel %vm64_vm3, %v627_v49, %v625_v27 }
 0xaa3   :  { %v630_v50 = vmul.f32 %v1048_v29, %v629_v7  ;;  %v631_v51 = vmul.f32 %v1053_v30, %v628_v8 }
 0xaa5   :  { %v864_v55 = vpack.c.bf16 %v630_v50, %v622_v9  ;;  %v635_v56 = vpop.permute.xlu1 %634  ;;  %v862_v59 = vpack.c.bf16 %v631_v51, %v623_v10  ;;  %v649_v6 = vpop.permute.xlu0 %648  ;;  %v906_v9 = vld [vmem:[%s1421_s0] sm:$0xff]  ;;  %v907_v50 = vld [vmem:[%s1421_s0 + $0x8] sm:$0xff] }
 0xaa6   :  { %v636_v60 = vsel %vm76_vm4, %v633_v44, %v635_v56  ;;  %v637_v61 = vsel %vm76_vm4, %v635_v56, %v633_v44 }
 0xaa7   :  { %v638_v5 = vmul.f32 %v1067_v39, %v636_v60  ;;  %v639_v25 = vmul.f32 %v1072_v40, %v637_v61  ;;  %863 = vmatprep.subr.bf16.mxu1 %v862_v59 }
 0xaa8   :  { %865 = vmatpush1.bf16.msra.mxu1 %v864_v55 }
 0xaa9   :  { %v868_v26 = vpack.c.bf16 %v638_v5, %v1327_v1  ;;  %v643_v29 = vpop.permute.xlu1 %642  ;;  %v866_v30 = vpack.c.bf16 %v639_v25, %v599_v2  ;;  %v657_v17 = vpop.permute.xlu0 %656 }
 0xaaa   :  { %v644_v12 = vsel %vm88_vm5, %v641_v52, %v643_v29  ;;  %v645_v21 = vsel %vm88_vm5, %v643_v29, %v641_v52 }
 0xaab   :  { %867 = vmatprep.subr.bf16.mxu1 %v866_v30  ;;  %v646_v15 = vmul.f32 %v1086_v53, %v644_v12  ;;  %v647_v16 = vmul.f32 %v1092_v54, %v645_v21 }
 0xaac   :  { %869 = vmatpush1.bf16.msra.mxu1 %v868_v26 }
 0xaad   :  { %v651_v13 = vpop.permute.xlu1 %650 }
 0xaae   :  { %v652_v39 = vsel %vm100_vm6, %v649_v6, %v651_v13  ;;  %v653_v40 = vsel %vm100_vm6, %v651_v13, %v649_v6 }
 0xaaf   :  { %v654_v3 = vmul.f32 %v1101_v57, %v652_v39  ;;  %v655_v63 = vmul.f32 %v1106_v58, %v653_v40 }
 0xab1   :  { %v872_v32 = vpack.c.bf16 %v654_v3, %v646_v15  ;;  %v659_v18 = vpop.permute.xlu1 %658  ;;  %v870_v19 = vpack.c.bf16 %v655_v63, %v647_v16 }
 0xab2   :  { %v661_v0 = vsel %vm112_vm7, %v659_v18, %v657_v17  ;;  %v660_v1 = vsel %vm112_vm7, %v657_v17, %v659_v18 }
 0xab3   :  { %v663_v2 = vmul.f32 %v1120_v11, %v661_v0  ;;  %871 = vmatprep.subr.bf16.mxu1 %v870_v19  ;;  %v662_v53 = vmul.f32 %v1125_v14, %v660_v1 }
 0xab4   :  { %873 = vmatpush1.bf16.msra.mxu1 %v872_v32 }
 0xab5   :  { %680 = vmatprep.subr.mxu1 %v663_v2 }
 0xab8   :  { %681 = vmatpush1.msra.mxu1 %v662_v53 }
 0xab9   :  { %809 = vmatmul.mubr.msk.f32.vlgmr.msra.gmra.mrb[2].mxu1 %vm120_vm8, %v1229_v33 }
 0xb8c   :  { %v730_v54 = vpop.f32.mrb[2].mxu1 }
 0xb8d   :  { %v732_v57 = vpop.f32.mrb[3].mxu1  ;;  %v738_v58 = vmul.f32 %v730_v54, %v730_v54 }
 0xb8e   :  { %v739_v62 = vmul.f32 %v732_v57, %v732_v57  ;;  %v735_v46 = vadd.f32 %v732_v57, %v730_v54 }
 0xb90   :  { %736 = vadd.xlane.f32.xlu0 %v735_v46  ;;  %v740_v23 = vadd.f32 %v739_v62, %v738_v58 }
 0xb92   :  { %741 = vadd.xlane.f32.xlu1 %v740_v23 }
 0xc1d   :  { %v737_v4 = vpop.xlane.xlu0 %736 }
 0xc1e   :  { %v743_v20 = vrot.slane %v737_v4, 4 }
 0xc1f   :  { %v742_v11 = vpop.xlane.xlu1 %741 }
 0xc20   :  { %v744_v22 = vadd.f32 %v743_v20, %v737_v4  ;;  %v745_v24 = vrot.slane %v742_v11, 4 }
 0xc22   :  { %v747_v27 = vmul.f32 0.001953125, %v744_v22  ;;  %v746_v28 = vadd.f32 %v745_v24, %v742_v11 }
 0xc24   :  { %v749_v14 = vmul.f32 %v747_v27, %v747_v27  ;;  %v748_v31 = vmul.f32 0.001953125, %v746_v28 }
 0xc26   :  { %v750_v34 = vsub.f32 %v748_v31, %v749_v14 }
 0xc28   :  { %v751_v35 = vadd.f32 1e-05, %v750_v34 }
 0xc2a   :  { %904 = vrsqrt.f32 %v751_v35 }
 0xc34   :  { %v905_v33 = vpop.eup %904 }
 0xc35   :  { %754 = vrot.lane.b32.xlu0 %v905_v33, %s920_s1 }
 0xca7   :  { %v755_v36 = vpop.permute.xlu0 %754 }
 0xca8   :  { %v757_v37 = vmul.f32 %v755_v36, %v1146_v47 }
 0xcaa   :  { %759 = vrot.lane.b32.xlu1 %v757_v37, %s921_s27 }
 0xcae   :  { %769 = vperm.xlu1 %896, %v757_v37  }
 0xd1c   :  { %v760_v38 = vpop.permute.xlu1 %759 }
 0xd1d   :  { %v762_v41 = vmul.f32 %v760_v38, %v747_v27 }
 0xd1f   :  { %764 = vrot.lane.b32.xlu0 %v762_v41, %s923_s28 }
 0xd2d   :  { %v770_v44 = vpop.permute.xlu1 %769 }
 0xd2e   :  { %v772_v45 = vmul.f32 %v770_v44, %v730_v54  ;;  %v773_v48 = vmul.f32 %v770_v44, %v732_v57 }
 0xd91   :  { %v765_v42 = vpop.permute.xlu0 %764 }
 0xd92   :  { %v767_v43 = vsub.f32 %v1146_v47, %v765_v42 }
 0xd94   :  { %776 = vperm.xlu0 %897, %v767_v43  }
 0xe13   :  { %v777_v49 = vpop.permute.xlu0 %776 }
 0xe14   :  { %v779_v8 = vadd.f32 %v777_v49, %v772_v45  ;;  %v780_v7 = vadd.f32 %v777_v49, %v773_v48 }
 0xe16   :  { %v781_v10 = vadd.f32 %v906_v9, %v779_v8  ;;  %v782_v51 = vadd.f32 %v907_v50, %v780_v7 }
 0xe18   :  { %v783_v52 = vmax.f32 %v781_v10, 0.0  ;;  %v784_v55 = vmax.f32 %v782_v51, 0.0 }
 0xe1a   :  { %785 = vst [vmem:[%s1425_s4] sm:$0xff] %v783_v52  ;;  %786 = vst [vmem:[%s1425_s4 + $0x8] sm:$0xff] %v784_v55 }

</bundles_post_ra>
